<compile_context>
chip_gen: v5e
topology: v5e:2x2
jax: 0.10.0
libtpu: 0.0.40
codegen_flags: <defaults>
</compile_context>

<pallas_src>
import functools

import numpy as np
import jax
import jax.numpy as jnp
from jax import lax
from jax.experimental import pallas as pl
from jax.experimental.pallas import tpu as pltpu


# ---------------------------------------------------------------------------
# small helpers
# ---------------------------------------------------------------------------

def _nbytes(shape, dtype):
    return int(np.prod(shape)) * np.dtype(dtype).itemsize


def _vmem_limit(block_bytes):
    # generous headroom over the per-step working set, capped so the request is
    # also valid on v7x (64 MiB physical VMEM).
    return int(min(64 * 2**20, max(32 * 2**20, 4 * int(block_bytes))))


def _band_rows(h, w, band_tokens):
    """Largest divisor of h with at most `band_tokens` rows*cols per band."""
    r = max(1, min(h, band_tokens // max(w, 1)))
    while h % r:
        r -= 1
    return r


# ---------------------------------------------------------------------------
# Pallas kernels
# ---------------------------------------------------------------------------

def _pointwise_kernel(*refs, relu, res_mode, res_pool):
    """Fused 1x1 conv + folded BN (+ fused residual branch) (+ ReLU).

    y = act( x @ W * s + b  [+ identity]  [+ (avgpool2(xr) @ Wd) * sd + bd] )

    res_mode: 0 = no residual, 1 = plain identity add,
              2 = projected identity (optional 2x2 avg-pool -> 1x1 conv -> BN).
    """
    x_ref, w_ref, s_ref, b_ref = refs[:4]
    i = 4
    r_ref = wd_ref = sd_ref = bd_ref = None
    if res_mode:
        r_ref = refs[i]
        i += 1
    if res_mode == 2:
        wd_ref, sd_ref, bd_ref = refs[i], refs[i + 1], refs[i + 2]
        i += 3
    o_ref = refs[i]

    _, R, W, Cin = x_ref.shape
    M = R * W
    Cout = w_ref.shape[-1]

    y = jnp.dot(x_ref[0].reshape(M, Cin), w_ref[...],
                preferred_element_type=jnp.float32)
    y = y * s_ref[...] + b_ref[...]

    if res_mode == 1:
        _, Rr, Wr, Cr = r_ref.shape
        y = y + r_ref[0].reshape(Rr * Wr, Cr).astype(jnp.float32)
    elif res_mode == 2:
        _, Rr, Wr, Cr = r_ref.shape
        r = r_ref[0].astype(jnp.float32)
        if res_pool:
            # AvgPool2d(2) on the VPU: pair-sum along W, then along H.
            r = r.reshape(Rr * Wr // 2, 2, Cr)
            r = r[:, 0, :] + r[:, 1, :]
            r = r.reshape(Rr // 2, 2, Wr // 2, Cr)
            r = (r[:, 0, :, :] + r[:, 1, :, :]) * 0.25
        r = r.reshape(M, Cr)
        idn = jnp.dot(r.astype(wd_ref.dtype), wd_ref[...],
                      preferred_element_type=jnp.float32)
        y = y + idn * sd_ref[...] + bd_ref[...]

    if relu:
        y = jnp.maximum(y, 0.0)
    o_ref[0] = y.reshape(R, W, Cout).astype(o_ref.dtype)


def _conv3x3_kernel(x_ref, w_ref, s_ref, b_ref, m_ref, o_ref, xs_ref,
                    *, relu, pool):
    """3x3 / stride-1 / pad-1 conv + folded BN (+ ReLU, + fused AvgPool2d(2)).

    The padded image is staged in VMEM as three flat lane-dense copies of shape
    ((H+2)*W, Cin), one per horizontal tap offset (built with one plain copy and
    two masked shifted copies).  Every one of the 9 taps is then a 2-D matmul
    whose LHS is a row-offset slice of one of those copies: no per-tap strided
    reshape copies, no wrapper-side jnp.pad, f32 accumulation in vregs.
    """
    _, H, W, Cin = x_ref.shape
    Cout = w_ref.shape[-1]
    M = H * W
    MP = (H + 2) * W
    dt = xs_ref.dtype

    # zero the vertical halo rows of all three copies
    zpad = jnp.zeros((W, Cin), dt)
    for s in range(3):
        xs_ref[s, pl.ds(0, W), :] = zpad
        xs_ref[s, pl.ds(MP - W, W), :] = zpad

    # kx == 1 (centre): straight copy of the image, flattened to (H*W, Cin).
    xs_ref[1, pl.ds(W, M), :] = x_ref[0].reshape(M, Cin)
    # kx == 0 (left neighbour):  S0[j] = S1[j-1], zeroed where output col == 0.
    m_l = m_ref[pl.ds(1, MP - 1), 0:1].astype(dt)
    xs_ref[0, pl.ds(1, MP - 1), :] = xs_ref[1, pl.ds(0, MP - 1), :] * m_l
    # kx == 2 (right neighbour): S2[j] = S1[j+1], zeroed where output col == W-1.
    m_r = m_ref[pl.ds(0, MP - 1), 1:2].astype(dt)
    xs_ref[2, pl.ds(0, MP - 1), :] = xs_ref[1, pl.ds(1, MP - 1), :] * m_r

    # 9 taps = 9 MXU matmuls on flat operands (row-offset slices, no reshapes)
    acc = jnp.zeros((M, Cout), jnp.float32)
    for ky in range(3):
        for kx in range(3):
            lhs = xs_ref[kx, pl.ds(ky * W, M), :]
            acc = acc + jnp.dot(lhs, w_ref[3 * ky + kx],
                                preferred_element_type=jnp.float32)

    y = acc * s_ref[...] + b_ref[...]
    if relu:
        y = jnp.maximum(y, 0.0)

    if pool:
        Ho, Wo = H // 2, W // 2
        # AvgPool2d(2) on the VPU: pair-sum along W, then along H.
        y = y.reshape(M // 2, 2, Cout)
        y = y[:, 0, :] + y[:, 1, :]
        y = y.reshape(Ho, 2, Wo, Cout)
        y = (y[:, 0, :, :] + y[:, 1, :, :]) * 0.25
        o_ref[0] = y.astype(o_ref.dtype)
    else:
        o_ref[0] = y.reshape(H, W, Cout).astype(o_ref.dtype)


# ---------------------------------------------------------------------------
# pallas_call wrappers
# ---------------------------------------------------------------------------

def _conv1x1_bn_act(x, w, scale_bias, *, relu, residual=None, proj=None,
                    proj_pool=False, band_tokens=4096):
    """Fused 1x1 conv + BN [+ (projected) residual] + ReLU, row-band tiled."""
    scale, bias = scale_bias
    B, H, W, Cin = x.shape
    Cout = w.shape[1]
    R = _band_rows(H, W, band_tokens)
    nb = H // R

    res_mode = 0 if residual is None else (2 if proj is not None else 1)
    pf = 2 if (res_mode == 2 and proj_pool) else 1

    inputs = [x, w, scale, bias]
    in_specs = [
        pl.BlockSpec((1, R, W, Cin), lambda b, r: (b, r, 0, 0)),
        pl.BlockSpec((Cin, Cout), lambda b, r: (0, 0)),
        pl.BlockSpec((1, Cout), lambda b, r: (0, 0)),
        pl.BlockSpec((1, Cout), lambda b, r: (0, 0)),
    ]
    flops = 2 * B * H * W * Cin * Cout
    block_bytes = (_nbytes((R, W, Cin), x.dtype) + _nbytes((R, W, Cout), x.dtype)
                   + _nbytes((Cin, Cout), w.dtype)
                   + _nbytes((R * W, Cout), jnp.float32))
    if res_mode:
        _, Hr, Wr, Cr = residual.shape
        inputs.append(residual)
        in_specs.append(pl.BlockSpec((1, pf * R, Wr, Cr),
                                     lambda b, r: (b, r, 0, 0)))
        block_bytes += _nbytes((pf * R, Wr, Cr), residual.dtype)
    if res_mode == 2:
        wd, (sd, bd) = proj
        Cr = wd.shape[0]
        inputs += [wd, sd, bd]
        in_specs += [
            pl.BlockSpec((Cr, Cout), lambda b, r: (0, 0)),
            pl.BlockSpec((1, Cout), lambda b, r: (0, 0)),
            pl.BlockSpec((1, Cout), lambda b, r: (0, 0)),
        ]
        flops += 2 * B * H * W * Cr * Cout
        block_bytes += _nbytes((Cr, Cout), wd.dtype)
    bytes_accessed = (sum(_nbytes(a.shape, a.dtype) for a in inputs)
                      + _nbytes((B, H, W, Cout), x.dtype))

    kernel = functools.partial(_pointwise_kernel, relu=relu,
                               res_mode=res_mode, res_pool=(pf == 2))
    return pl.pallas_call(
        kernel,
        grid=(B, nb),
        in_specs=in_specs,
        out_specs=pl.BlockSpec((1, R, W, Cout), lambda b, r: (b, r, 0, 0)),
        out_shape=jax.ShapeDtypeStruct((B, H, W, Cout), x.dtype),
        compiler_params=pltpu.CompilerParams(
            dimension_semantics=("parallel", "parallel"),
            vmem_limit_bytes=_vmem_limit(block_bytes)),
        cost_estimate=pl.CostEstimate(flops=int(flops), transcendentals=0,
                                      bytes_accessed=int(bytes_accessed)),
    )(*inputs)


def _conv3x3_bn_act(x, w_taps, scale_bias, *, relu, pool):
    scale, bias = scale_bias
    B, H, W, Cin = x.shape
    Cout = w_taps.shape[-1]
    Ho, Wo = (H // 2, W // 2) if pool else (H, W)
    MP = (H + 2) * W

    # column-validity masks for the two horizontally shifted copies
    col = np.arange(MP, dtype=np.int64) % W
    masks = np.stack([col != 0, col != (W - 1)], axis=1).astype(np.float32)
    masks = jnp.asarray(masks, dtype=x.dtype)

    kernel = functools.partial(_conv3x3_kernel, relu=relu, pool=pool)
    flops = 2 * B * H * W * 9 * Cin * Cout
    bytes_accessed = (_nbytes(x.shape, x.dtype)
                      + _nbytes(w_taps.shape, w_taps.dtype)
                      + _nbytes((B, Ho, Wo, Cout), x.dtype)
                      + _nbytes(masks.shape, masks.dtype))
    block_bytes = (_nbytes((H, W, Cin), x.dtype)
                   + _nbytes((Ho, Wo, Cout), x.dtype)
                   + _nbytes((9, Cin, Cout), w_taps.dtype)
                   + _nbytes((3, MP, Cin), x.dtype)       # shifted-copy scratch
                   + _nbytes((H * W, Cout), jnp.float32)  # f32 accumulator
                   + _nbytes(masks.shape, masks.dtype))

    return pl.pallas_call(
        kernel,
        grid=(B,),
        in_specs=[
            pl.BlockSpec((1, H, W, Cin), lambda b: (b, 0, 0, 0)),
            pl.BlockSpec((9, Cin, Cout), lambda b: (0, 0, 0)),
            pl.BlockSpec((1, Cout), lambda b: (0, 0)),
            pl.BlockSpec((1, Cout), lambda b: (0, 0)),
            pl.BlockSpec((MP, 2), lambda b: (0, 0)),
        ],
        out_specs=pl.BlockSpec((1, Ho, Wo, Cout), lambda b: (b, 0, 0, 0)),
        out_shape=jax.ShapeDtypeStruct((B, Ho, Wo, Cout), x.dtype),
        scratch_shapes=[pltpu.VMEM((3, MP, Cin), x.dtype)],
        compiler_params=pltpu.CompilerParams(
            dimension_semantics=("parallel",),
            vmem_limit_bytes=_vmem_limit(block_bytes)),
        cost_estimate=pl.CostEstimate(flops=int(flops), transcendentals=0,
                                      bytes_accessed=int(bytes_accessed)),
    )(x, w_taps, scale, bias, masks)


# ---------------------------------------------------------------------------
# Parameter construction (PyTorch layout) and TPU-layout preparation
# ---------------------------------------------------------------------------

def _make_conv(key, cout, cin, k):
    std = 1.0 / float(np.sqrt(cin * k * k))
    return std * jax.random.normal(key, (cout, cin, k, k), jnp.float32)


def _make_bn(key, c):
    k1, k2, k3, k4 = jax.random.split(key, 4)
    return {
        "gamma": 1.0 + 0.1 * jax.random.normal(k1, (c,), jnp.float32),
        "beta": 0.1 * jax.random.normal(k2, (c,), jnp.float32),
        "mean": 0.1 * jax.random.normal(k3, (c,), jnp.float32),
        "var": 0.5 + jax.random.uniform(k4, (c,), jnp.float32),
    }


def init_modified_resnet(key, layers, width):
    """Raw parameters in PyTorch convention (conv OIHW, BN running stats)."""
    keys = iter(jax.random.split(key, 256))
    raw = {
        "stem": {
            "conv1": _make_conv(next(keys), width // 2, 3, 3),
            "bn1": _make_bn(next(keys), width // 2),
            "conv2": _make_conv(next(keys), width // 2, width // 2, 3),
            "bn2": _make_bn(next(keys), width // 2),
            "conv3": _make_conv(next(keys), width, width // 2, 3),
            "bn3": _make_bn(next(keys), width),
        },
        "layers": [],
    }
    inplanes = width
    for i, blocks in enumerate(layers):
        planes = width * (2 ** i)
        layer_stride = 1 if i == 0 else 2
        layer = []
        for j in range(blocks):
            s = layer_stride if j == 0 else 1
            blk = {
                "stride": s,
                "conv1": _make_conv(next(keys), planes, inplanes, 1),
                "bn1": _make_bn(next(keys), planes),
                "conv2": _make_conv(next(keys), planes, planes, 3),
                "bn2": _make_bn(next(keys), planes),
                "conv3": _make_conv(next(keys), planes * 4, planes, 1),
                "bn3": _make_bn(next(keys), planes * 4),
            }
            if s > 1 or inplanes != planes * 4:
                blk["downsample"] = {
                    "conv": _make_conv(next(keys), planes * 4, inplanes, 1),
                    "bn": _make_bn(next(keys), planes * 4),
                }
            else:
                blk["downsample"] = None
            layer.append(blk)
            inplanes = planes * 4
        raw["layers"].append(layer)
    return raw


def _fold_bn(bn, eps=1e-5):
    scale = bn["gamma"] * jax.lax.rsqrt(bn["var"] + eps)
    shift = bn["beta"] - bn["mean"] * scale
    c = scale.shape[0]
    return scale.reshape(1, c), shift.reshape(1, c)       # kept in f32


def _prep_1x1(w, dtype):     # (Cout, Cin, 1, 1) -> (Cin, Cout)
    cout, cin = w.shape[0], w.shape[1]
    return jnp.transpose(w.reshape(cout, cin), (1, 0)).astype(dtype)


def _prep_3x3(w, dtype):     # (Cout, Cin, 3, 3) -> (9, Cin, Cout), tap-major (ky,kx)
    return jnp.transpose(w, (2, 3, 1, 0)).reshape(9, w.shape[1], w.shape[0]).astype(dtype)


def _prep_stem1(w, dtype):   # stride-2 stem conv: (Cout, 3, 3, 3) -> (27, Cout)
    return jnp.transpose(w, (2, 3, 1, 0)).reshape(27, w.shape[0]).astype(dtype)


def prepare_params(raw, dtype=jnp.bfloat16):
    st = raw["stem"]
    prep = {
        "dtype": dtype,
        "stem": {
            "w1": _prep_stem1(st["conv1"], dtype), "sb1": _fold_bn(st["bn1"]),
            "w2": _prep_3x3(st["conv2"], dtype), "sb2": _fold_bn(st["bn2"]),
            "w3": _prep_3x3(st["conv3"], dtype), "sb3": _fold_bn(st["bn3"]),
        },
        "layers": [],
    }
    for layer in raw["layers"]:
        blocks = []
        for blk in layer:
            p = {
                "stride": blk["stride"],
                "w1": _prep_1x1(blk["conv1"], dtype), "sb1": _fold_bn(blk["bn1"]),
                "w2": _prep_3x3(blk["conv2"], dtype), "sb2": _fold_bn(blk["bn2"]),
                "w3": _prep_1x1(blk["conv3"], dtype), "sb3": _fold_bn(blk["bn3"]),
            }
            if blk["downsample"] is not None:
                p["wd"] = _prep_1x1(blk["downsample"]["conv"], dtype)
                p["sbd"] = _fold_bn(blk["downsample"]["bn"])
            else:
                p["wd"] = None
            blocks.append(p)
        prep["layers"].append(blocks)
    return prep


# ---------------------------------------------------------------------------
# Forward pass built from the Pallas kernels
# ---------------------------------------------------------------------------

def _bottleneck(x, blk, band_tokens):
    pool = blk["stride"] > 1
    out = _conv1x1_bn_act(x, blk["w1"], blk["sb1"], relu=True,
                          band_tokens=band_tokens)
    out = _conv3x3_bn_act(out, blk["w2"], blk["sb2"], relu=True, pool=pool)
    if blk["wd"] is not None:
        # conv3 + bn3 + (avgpool + downsample conv + bn) + add + relu in ONE
        # kernel: the identity branch never round-trips through HBM.
        return _conv1x1_bn_act(out, blk["w3"], blk["sb3"], relu=True,
                               residual=x, proj=(blk["wd"], blk["sbd"]),
                               proj_pool=pool, band_tokens=band_tokens)
    return _conv1x1_bn_act(out, blk["w3"], blk["sb3"], relu=True,
                           residual=x, band_tokens=band_tokens)


def modified_resnet_forward(x_nchw, params, band_tokens=4096):
    """x_nchw: (B, 3, H, W) -> (B, (H//32)*(W//32), width*32) tokens."""
    dtype = params["dtype"]
    x = jnp.transpose(x_nchw, (0, 2, 3, 1)).astype(dtype)   # NHWC
    st = params["stem"]
    B, H, W, _ = x.shape

    # stem conv1: 3x3 / stride 2 / pad 1 on 3 input channels.
    # TODO(synk): the stride-2 patch extraction (im2col, 27 channels at half
    # resolution) stays wrapper-side; the matmul runs in the Pallas kernel.
    Ho, Wo = H // 2, W // 2
    xp = jnp.pad(x, ((0, 0), (1, 1), (1, 1), (0, 0)))
    cols = [xp[:, ky:ky + 2 * Ho:2, kx:kx + 2 * Wo:2, :]
            for ky in range(3) for kx in range(3)]
    xcol = jnp.concatenate(cols, axis=-1)                    # (B, H/2, W/2, 27)
    h = _conv1x1_bn_act(xcol, st["w1"], st["sb1"], relu=True,
                        band_tokens=band_tokens)

    h = _conv3x3_bn_act(h, st["w2"], st["sb2"], relu=True, pool=False)
    h = _conv3x3_bn_act(h, st["w3"], st["sb3"], relu=True, pool=True)

    for layer in params["layers"]:
        for blk in layer:
            h = _bottleneck(h, blk, band_tokens)

    B2, Hf, Wf, C = h.shape
    # == PyTorch x.reshape(B, C, -1).permute(0, 2, 1) on the NCHW tensor
    return h.reshape(B2, Hf * Wf, C)


# ---------------------------------------------------------------------------
# Pure-JAX reference (eval-mode BatchNorm) for correctness checking
# ---------------------------------------------------------------------------

def _conv_ref(x, w, stride=1, padding=0):
    return lax.conv_general_dilated(
        x, jnp.transpose(w, (2, 3, 1, 0)),
        window_strides=(stride, stride),
        padding=[(padding, padding), (padding, padding)],
        dimension_numbers=("NHWC", "HWIO", "NHWC"),
        precision=lax.Precision.HIGHEST)


def _bn_ref(x, bn, eps=1e-5):
    scale = bn["gamma"] * jax.lax.rsqrt(bn["var"] + eps)
    shift = bn["beta"] - bn["mean"] * scale
    return x * scale + shift


def _avgpool_ref(x, k):
    B, H, W, C = x.shape
    return x.reshape(B, H // k, k, W // k, k, C).mean(axis=(2, 4))


def reference_forward(x_nchw, raw):
    h = jnp.transpose(x_nchw, (0, 2, 3, 1)).astype(jnp.float32)
    st = raw["stem"]
    h = jax.nn.relu(_bn_ref(_conv_ref(h, st["conv1"], stride=2, padding=1), st["bn1"]))
    h = jax.nn.relu(_bn_ref(_conv_ref(h, st["conv2"], padding=1), st["bn2"]))
    h = jax.nn.relu(_bn_ref(_conv_ref(h, st["conv3"], padding=1), st["bn3"]))
    h = _avgpool_ref(h, 2)
    for layer in raw["layers"]:
        for blk in layer:
            out = jax.nn.relu(_bn_ref(_conv_ref(h, blk["conv1"]), blk["bn1"]))
            out = jax.nn.relu(_bn_ref(_conv_ref(out, blk["conv2"], padding=1), blk["bn2"]))
            if blk["stride"] > 1:
                out = _avgpool_ref(out, blk["stride"])
            out = _bn_ref(_conv_ref(out, blk["conv3"]), blk["bn3"])
            if blk["downsample"] is not None:
                idn = _avgpool_ref(h, blk["stride"]) if blk["stride"] > 1 else h
                identity = _bn_ref(_conv_ref(idn, blk["downsample"]["conv"]),
                                   blk["downsample"]["bn"])
            else:
                identity = h
            h = jax.nn.relu(out + identity)
    B, H, W, C = h.shape
    return h.reshape(B, H * W, C)


# ---------------------------------------------------------------------------
# Test
# ---------------------------------------------------------------------------

if __name__ == "__main__":
    layers = (1, 1, 1, 1)      # small ModifiedResNet (CLIP RN50 would be (3,4,6,3))
    width = 16                 # small width (CLIP RN50 uses 64)
    input_resolution = 64      # must be a multiple of 32 (total stride of the net)
    batch = 2

    key = jax.random.PRNGKey(0)
    kp, kx = jax.random.split(key)
    raw = init_modified_resnet(kp, layers, width)
    x = jax.random.normal(kx, (batch, 3, input_resolution, input_resolution),
                          jnp.float32)

    ref = jax.block_until_ready(reference_forward(x, raw))
    tokens = (input_resolution // 32) ** 2

    # 1) f32 pipeline with tiny row-bands: tight numerical check of the kernel
    #    logic and of the multi-band grid path.
    p32 = prepare_params(raw, jnp.float32)
    out32 = jax.block_until_ready(modified_resnet_forward(x, p32, band_tokens=32))
    assert out32.shape == (batch, tokens, width * 32), out32.shape
    assert np.allclose(np.asarray(out32), np.asarray(ref), rtol=2e-3, atol=2e-3), \
        f"f32 mismatch vs JAX reference (max abs err " \
        f"{float(jnp.max(jnp.abs(out32 - ref)))})"

    # 2) bf16 pipeline (the performance configuration): f32 accumulation keeps
    #    the error small but not at f32 level, so use a looser relative check.
    pbf = prepare_params(raw, jnp.bfloat16)
    outbf = jax.block_until_ready(modified_resnet_forward(x, pbf))
    assert outbf.shape == (batch, tokens, width * 32), outbf.shape
    assert outbf.dtype == jnp.bfloat16
    rel = float(jnp.max(jnp.abs(outbf.astype(jnp.float32) - ref)) /
                (jnp.max(jnp.abs(ref)) + 1e-6))
    assert rel < 0.1, f"bf16 relative error too large: {rel}"

    print("KERNEL_OK")
</pallas_src>

<mosaic_0001>
module attributes {stable_mosaic.version = 11 : i64} {
  func.func @_pointwise_kernel(%arg0: i32, %arg1: i32, %arg2: memref<1x1x32x27xf32, #tpu.memory_space<vmem>>, %arg3: memref<27x8xf32, #tpu.memory_space<vmem>>, %arg4: memref<1x8xf32, #tpu.memory_space<vmem>>, %arg5: memref<1x8xf32, #tpu.memory_space<vmem>>, %arg6: memref<1x1x32x8xf32, #tpu.memory_space<vmem>>) attributes {dimension_semantics = [#tpu.dimension_semantics<parallel>, #tpu.dimension_semantics<parallel>], iteration_bounds = array<i64: 2, 32>, scalar_prefetch = 0 : i64, scratch_operands = 0 : i64, tpu.core_type = #tpu.core_type<tc>, window_params = [{transform_indices = @transform_0, window_bounds = array<i64: 1, 1, 32, 27>}, {pipeline_mode = #tpu.pipeline_mode<synchronous>, transform_indices = @transform_1, window_bounds = array<i64: 27, 8>}, {pipeline_mode = #tpu.pipeline_mode<synchronous>, transform_indices = @transform_2, window_bounds = array<i64: 1, 8>}, {pipeline_mode = #tpu.pipeline_mode<synchronous>, transform_indices = @transform_3, window_bounds = array<i64: 1, 8>}, {transform_indices = @transform_4, window_bounds = array<i64: 1, 1, 32, 8>}]} {
    %c0 = arith.constant 0 : index
    %c0_0 = arith.constant 0 : index
    %c0_1 = arith.constant 0 : index
    %c0_2 = arith.constant 0 : index
    %0 = vector.load %arg2[%c0, %c0_0, %c0_1, %c0_2] : memref<1x1x32x27xf32, #tpu.memory_space<vmem>>, vector<1x1x32x27xf32>
    %1 = vector.shape_cast %0 : vector<1x1x32x27xf32> to vector<1x32x27xf32>
    %2 = vector.shape_cast %1 : vector<1x32x27xf32> to vector<32x27xf32>
    %c0_3 = arith.constant 0 : index
    %c0_4 = arith.constant 0 : index
    %3 = vector.load %arg3[%c0_3, %c0_4] : memref<27x8xf32, #tpu.memory_space<vmem>>, vector<27x8xf32>
    %cst = arith.constant dense<0.000000e+00> : vector<32x8xf32>
    %4 = tpu.matmul %2, %3, %cst {dimension_numbers = #tpu.dot_dimension_numbers<[1], [0], [0], [1], [0, 0, 1, 1], [], []>} : vector<32x27xf32>, vector<27x8xf32>, vector<32x8xf32> -> vector<32x8xf32>
    %c0_5 = arith.constant 0 : index
    %c0_6 = arith.constant 0 : index
    %5 = vector.load %arg4[%c0_5, %c0_6] : memref<1x8xf32, #tpu.memory_space<vmem>>, vector<1x8xf32>
    %6 = vector.broadcast %5 : vector<1x8xf32> to vector<32x8xf32>
    %7 = arith.mulf %4, %6 : vector<32x8xf32>
    %c0_7 = arith.constant 0 : index
    %c0_8 = arith.constant 0 : index
    %8 = vector.load %arg5[%c0_7, %c0_8] : memref<1x8xf32, #tpu.memory_space<vmem>>, vector<1x8xf32>
    %9 = vector.broadcast %8 : vector<1x8xf32> to vector<32x8xf32>
    %10 = arith.addf %7, %9 : vector<32x8xf32>
    %cst_9 = arith.constant 0.000000e+00 : f32
    %11 = vector.broadcast %cst_9 : f32 to vector<32x8xf32>
    %12 = arith.maximumf %10, %11 : vector<32x8xf32>
    %13 = vector.shape_cast %12 : vector<32x8xf32> to vector<1x32x8xf32>
    %c0_10 = arith.constant 0 : index
    %c0_11 = arith.constant 0 : index
    %c0_12 = arith.constant 0 : index
    %c0_13 = arith.constant 0 : index
    %14 = vector.load %arg6[%c0_10, %c0_11, %c0_12, %c0_13] : memref<1x1x32x8xf32, #tpu.memory_space<vmem>>, vector<1x1x32x8xf32>
    %15 = vector.shape_cast %14 : vector<1x1x32x8xf32> to vector<1x32x8xf32>
    %16 = vector.shape_cast %13 : vector<1x32x8xf32> to vector<1x1x32x8xf32>
    tpu.vector_store %arg6[%c0_10, %c0_11, %c0_12, %c0_13], %16 {strides = array<i32>} : memref<1x1x32x8xf32, #tpu.memory_space<vmem>>, vector<1x1x32x8xf32>,
    return
  }
  func.func @transform_0(%arg0: i32, %arg1: i32) -> (i32, i32, i32, i32) {
    %c0_i32 = arith.constant 0 : i32
    %c0_i32_0 = arith.constant 0 : i32
    %c0_i32_1 = arith.constant 0 : i32
    return %arg0, %arg1, %c0_i32, %c0_i32_0 : i32, i32, i32, i32
  }
  func.func @transform_1(%arg0: i32, %arg1: i32) -> (i32, i32) {
    %c0_i32 = arith.constant 0 : i32
    %c0_i32_0 = arith.constant 0 : i32
    %c0_i32_1 = arith.constant 0 : i32
    return %c0_i32, %c0_i32_0 : i32, i32
  }
  func.func @transform_2(%arg0: i32, %arg1: i32) -> (i32, i32) {
    %c0_i32 = arith.constant 0 : i32
    %c0_i32_0 = arith.constant 0 : i32
    %c0_i32_1 = arith.constant 0 : i32
    return %c0_i32, %c0_i32_0 : i32, i32
  }
  func.func @transform_3(%arg0: i32, %arg1: i32) -> (i32, i32) {
    %c0_i32 = arith.constant 0 : i32
    %c0_i32_0 = arith.constant 0 : i32
    %c0_i32_1 = arith.constant 0 : i32
    return %c0_i32, %c0_i32_0 : i32, i32
  }
  func.func @transform_4(%arg0: i32, %arg1: i32) -> (i32, i32, i32, i32) {
    %c0_i32 = arith.constant 0 : i32
    %c0_i32_0 = arith.constant 0 : i32
    %c0_i32_1 = arith.constant 0 : i32
    return %arg0, %arg1, %c0_i32, %c0_i32_0 : i32, i32, i32, i32
  }
}

</mosaic_0001>

<bundles_post_ra>
// kernel: tpu_custom_call.1
= control target key start
LH: loop header
LB: loop body
LE: loop exit
PB: predicated region body
PF: predicated region fallthrough
CT: control target
= control target key end

     0   :  { %s545_s15 = smov 0   ;;  %s547_s16 = smov 0   ;;  %s614_s0 = inlined_call_operand.vmem [shape: f32[2,32,32,27], index: 0, kind: input, shape index: {}]   ;;  %s615_s1 = inlined_call_operand.vmem [shape: f32[27,8], index: 1, kind: input, shape index: {}]   ;;  %s616_s2 = inlined_call_operand.vmem [shape: f32[1,8], index: 2, kind: input, shape index: {}]   ;;  %s617_s3 = inlined_call_operand.vmem [shape: f32[1,8], index: 3, kind: input, shape index: {}]   ;;  %s618_s4 = inlined_call_operand.vmem [shape: f32[2,32,32,8], index: 4, kind: output, shape index: {}]  }
   0x1   :  { %s549_s17 = smov 0   ;;  %s551_s18 = smov 0  }
   0x2   :  { %s553_s19 = smov 0  }
   0x3 LB: > { %s23_s20 = sadd.s32 1, %s510_s17  ;;  %s26_s21 = sadd.s32 1, %s514_s18  ;;  %s518_s19 = sphi %s553_s19, %s14_s19   ;;  %s514_s18 = sphi %s551_s18, %s622_s18   ;;  %s510_s17 = sphi %s549_s17, %s621_s17   ;;  %s506_s16 = sphi %s547_s16, %s620_s16   ;;  %s502_s15 = sphi %s545_s15, %s619_s15  }
   0x4   : > { %p24_p0 = scmp.ge.s32.totalorder %s23_s20, 32  ;;  %p412_p1 = scmp.ge.s32.totalorder %s518_s19, 1 }
   0x5   : > { %p182_p2 = scmp.lt.s32.totalorder %s518_s19, 65 }
   0x6   : > { %s624_s20 = smov (%p24_p0, %s23_s20), 0  ;;  %s626_s21 = smov (!%p24_p0, %s26_s21), %s514_s18 }
   0x7   : > { %p183_p3 = pnand %p412_p1, %p182_p2  ;;  %p28_p4 = scmp.ge.s32.totalorder %s626_s21, 2 }
   0x8   : > { %p216_p5 = scmp.lt.s32.totalorder (!%p183_p3), %s506_s16, 1  ;;  %p218_p6 = scmp.lt.s32.totalorder (!%p183_p3), %s502_s15, 31 }
   0x9   : > { %s628_s21 = smov (%p28_p4, %s626_s21), 0  ;;  %186 = sbr.rel (%p183_p3) target bundleno = 163 (0xa3), region = 36 }
   0xe   : > { %v241_v0 = vld [vmem:[%s615_s1 + $0x18] sm:$0x7]  ;;  %vm255_vm0 = vcmask 1042432   ;;  %v240_v1 = vld [vmem:[%s615_s1 + $0x10] sm:$0xff]  ;;  %v239_v2 = vld [vmem:[%s615_s1 + $0x8] sm:$0xff]  ;;  %s630_s16 = smov (!%p216_p5, %s506_s16), 1 }
   0xf   : > { %427 = vmatpush.msk.msra.mxu2 %vm255_vm0, %v241_v0  ;;  %428 = vmatpush.msk.msra.mxu3 %vm255_vm0, %v241_v0  ;;  %s632_s15 = smov (!%p218_p6, %s502_s15), 31  ;;  %v238_v3 = vld [vmem:[%s615_s1] sm:$0xff]  ;;  %s414_s30 = sshll.u32 %s630_s16, 7  ;;  %vm242_vm1 = vcmask 220160   ;;  %vm308_vm2 = vcmask 64512  }
  0x10   : > { %419 = vmatpush.msk.msra.mxu0 %vm255_vm0, %v241_v0  ;;  %426 = vmatpush.msk.msra.mxu1 %vm255_vm0, %v241_v0  ;;  %s413_s5 = sshll.u32 %s632_s15, 2  ;;  %v478_v8 = vld [vmem:[%s616_s2] ss:$0 sm:$0xff] }
  0x11   : > { %430 = vmatpush.msra.mxu2 %v240_v1  ;;  %431 = vmatpush.msra.mxu3 %v240_v1  ;;  %s222_s6 = sadd.s32 %s414_s30, %s413_s5  ;;  %v479_v9 = vld [vmem:[%s617_s3] ss:$0 sm:$0xff] }
  0x12   : > { %272 = vmatpush.msra.mxu0 %v240_v1  ;;  %429 = vmatpush.msra.mxu1 %v240_v1  ;;  %s415_s7 = sshll.u32 %s222_s6, 3 }
  0x13   : > { %433 = vmatpush.msra.mxu2 %v239_v2  ;;  %434 = vmatpush.msra.mxu3 %v239_v2  ;;  %s224_s10 = scalar_lea.vmem %s614_s0, %s415_s7  ;;  %s233_s22 = scalar_lea.vmem %s618_s4, %s415_s7 }
  0x14   : > { %273 = vmatpush.msra.mxu0 %v239_v2  ;;  %432 = vmatpush.msra.mxu1 %v239_v2  ;;  %v236_v4 = vld [vmem:[%s224_s10 + $0x10] sm:$0xff]  ;;  %v237_v5 = vld [vmem:[%s224_s10 + $0x18] sm:$0xff]  ;;  %v234_v6 = vld [vmem:[%s224_s10] sm:$0xff] }
  0x15   : > { %436 = vmatpush.msra.mxu2 %v238_v3  ;;  %437 = vmatpush.msra.mxu3 %v238_v3  ;;  %v235_v7 = vld [vmem:[%s224_s10 + $0x8] sm:$0xff] }
  0x16   : > { %274 = vmatpush.msra.mxu0 %v238_v3  ;;  %435 = vmatpush.msra.mxu1 %v238_v3 }
  0x17   : > { %422 = vmatmul.msk.f32.vlgmr.msra.gmra.mxu2 %vm242_vm1, %v236_v4  ;;  %423 = vmatmul.msk.f32.vlgmr.msra.gmra.mxu3 %vm242_vm1, %v237_v5 }
  0x18   : > { %420 = vmatmul.msk.f32.vlgmr.msra.gmra.mxu0 %vm242_vm1, %v234_v6  ;;  %421 = vmatmul.msk.f32.vlgmr.msra.gmra.mxu1 %vm242_vm1, %v235_v7 }
  0x95   : > { %v276_v10 = vpop.f32.mrf.mxu0  ;;  %v279_v11 = vpop.f32.mrf.mxu1 }
  0x96   : > { %v292_v12 = vmul.f32 %v478_v8, %v276_v10  ;;  %v293_v13 = vmul.f32 %v478_v8, %v279_v11 }
  0x98   : > { %v300_v14 = vadd.f32 %v479_v9, %v292_v12  ;;  %v301_v15 = vadd.f32 %v479_v9, %v293_v13 }
  0x9a   : > { %v304_v16 = vmax.f32 %v300_v14, 0.0  ;;  %v305_v17 = vmax.f32 %v301_v15, 0.0  ;;  %v282_v18 = vpop.f32.mrf.mxu2  ;;  %v285_v19 = vpop.f32.mrf.mxu3 }
  0x9b   : > { %v294_v20 = vmul.f32 %v478_v8, %v282_v18  ;;  %v295_v21 = vmul.f32 %v478_v8, %v285_v19 }
  0x9c   : > { %309 = vst.msk [vmem:[%s233_s22] sm:$0xff] %vm308_vm2, %v304_v16 }
  0x9d   : > { %310 = vst.msk [vmem:[%s233_s22 + $0x8] sm:$0xff] %vm308_vm2, %v305_v17  ;;  %v302_v22 = vadd.f32 %v479_v9, %v294_v20  ;;  %v303_v23 = vadd.f32 %v479_v9, %v295_v21 }
  0x9f   : > { %v306_v24 = vmax.f32 %v302_v22, 0.0  ;;  %v307_v25 = vmax.f32 %v303_v23, 0.0 }
  0xa1   : > { %311 = vst.msk [vmem:[%s233_s22 + $0x10] sm:$0xff] %vm308_vm2, %v306_v24 }
  0xa2   : > { %312 = vst.msk [vmem:[%s233_s22 + $0x18] sm:$0xff] %vm308_vm2, %v307_v25 }
  0xa3 PF: > { %s14_s19 = sadd.s32 1, %s518_s19   ;;  %s619_s15 = smov %s510_s17 }
  0xa4   : > { %p11_p7 = scmp.ge.s32.totalorder %s14_s19, 66   ;;  %s620_s16 = smov %s514_s18 }
  0xa5   : > { %s621_s17 = smov %s624_s20  ;;  %s622_s18 = smov %s628_s21 }
  0xa6   :  { %13 = sbr.rel (!%p11_p7) target bundleno = 3 (0x3), region = 66 }

</bundles_post_ra>
